<compile_context>
chip_gen: v7x
topology: tpu7x:2x2x1
jax: 0.10.0
libtpu: 0.0.40
codegen_flags: <defaults>
</compile_context>

<pallas_src>
from functools import partial

import numpy as np
import jax
import jax.numpy as jnp
from jax.experimental import pallas as pl
from jax.experimental.pallas import tpu as pltpu


# --------------------------------------------------------------------------- #
# Kernel 1: fused MLP (Linear + ReLU) + merged input-to-hidden gate projection.
# --------------------------------------------------------------------------- #
def mlp_gx_kernel(x_ref, wmlp_ref, bmlp_ref, wih_ref, bih_ref, gx_ref, *, mxu_dtype):
    # x: (TM, I) f32 -> cast MXU operand to bf16, accumulate in f32.
    y = jnp.dot(x_ref[...].astype(mxu_dtype), wmlp_ref[...],
                preferred_element_type=jnp.float32)
    y = jnp.maximum(y + bmlp_ref[...], 0.0)                      # (TM, H) f32
    gx = jnp.dot(y.astype(mxu_dtype), wih_ref[...],
                 preferred_element_type=jnp.float32) + bih_ref[...]
    gx_ref[...] = gx.astype(gx_ref.dtype)                        # (TM, 3H) bf16


# --------------------------------------------------------------------------- #
# Kernel 2: GRU recurrence over time, T_blk timesteps per grid step,
#           batch split over a leading "parallel" grid axis.
# --------------------------------------------------------------------------- #
def gru_kernel(gx_ref, h0_ref, whh_ref, bhn_ref, out_ref, h_scratch,
               *, t_blk, hidden, unroll, fuse_hh):
    tb = pl.program_id(1)                      # time-block index (grid axis 1)

    @pl.when(tb == 0)
    def _():
        h_scratch[...] = h0_ref[0]

    H = hidden
    whh = whh_ref[...]                         # (H, 3H) bf16, resident
    if not fuse_hh:
        # H not lane-aligned: split the weight ONCE (outside the time loop) so
        # the per-step matmuls need no in-loop lane-crossing slices of gh.
        whr = whh[:, :H]
        whz = whh[:, H:2 * H]
        whn = whh[:, 2 * H:]

    # Hoist the bias broadcast out of the (unrolled) time loop.
    b_blk = h_scratch.shape[0]
    bhn = jnp.broadcast_to(bhn_ref[...], (b_blk, H))

    def step(i, h):
        h_mx = h.astype(whh.dtype)             # bf16 MXU operand, f32 carry
        if fuse_hh:
            gh = jnp.dot(h_mx, whh, preferred_element_type=jnp.float32)
            ghr, ghz, ghn = gh[:, :H], gh[:, H:2 * H], gh[:, 2 * H:]
        else:
            ghr = jnp.dot(h_mx, whr, preferred_element_type=jnp.float32)
            ghz = jnp.dot(h_mx, whz, preferred_element_type=jnp.float32)
            ghn = jnp.dot(h_mx, whn, preferred_element_type=jnp.float32)
        gx = gx_ref[i].astype(jnp.float32)     # (B_blk, 3H) bf16 -> f32
        r = jax.nn.sigmoid(gx[:, :H] + ghr)
        z = jax.nn.sigmoid(gx[:, H:2 * H] + ghz)
        n = jnp.tanh(gx[:, 2 * H:] + r * (ghn + bhn))
        h_new = (1.0 - z) * n + z * h
        out_ref[i] = h_new
        return h_new

    h_final = jax.lax.fori_loop(0, t_blk, step, h_scratch[...], unroll=unroll)
    h_scratch[...] = h_final                   # carry across time-block grid steps


# --------------------------------------------------------------------------- #
# Tile-size selection (VMEM-budget driven).
# --------------------------------------------------------------------------- #
def _vmem_capacity_bytes():
    try:
        return int(getattr(pltpu.get_tpu_info(), "vmem_capacity_bytes"))
    except Exception:
        return 64 * 1024 * 1024                # conservative (v7x-sized) default


def _pick_row_tile(rows, in_feat, hidden, budget_bytes):
    if rows < 8:
        return rows
    # Resident: W_mlp^T + W_ih^T in bf16, biases in f32.
    resident = (in_feat * hidden + hidden * 3 * hidden) * 2 + 4 * hidden * 4
    fitting = []
    for tm in (1024, 512, 256, 128, 64, 32, 16, 8):
        if tm > rows:
            continue
        per_blk = 2 * tm * in_feat * 4 + 2 * tm * 3 * hidden * 2   # dbl-buffered io
        if resident + per_blk <= budget_bytes:
            fitting.append(tm)
    if not fitting:
        return 8
    for tm in fitting:                         # prefer exact tiling (no partial block)
        if rows % tm == 0:
            return tm
    return fitting[0]


def _pick_time_block(seq, b_blk, hidden, budget_bytes):
    resident = hidden * 3 * hidden * 2 + 4 * hidden * 4 + 2 * b_blk * hidden * 4
    for cand in (128, 64, 32, 16, 8, 4, 2, 1):
        if cand > seq or seq % cand:
            continue
        per_blk = 2 * cand * b_blk * (3 * hidden * 2 + hidden * 4)  # gx bf16 + out f32
        if resident + per_blk <= budget_bytes:
            return cand
    return 1


# --------------------------------------------------------------------------- #
# Wrapper.
# --------------------------------------------------------------------------- #
def gru_forward(x, params, h0=None):
    """x: (S, B, I) float32, time-major. Returns (gru_out, (hn, hn)) like torch."""
    S, B, I = x.shape
    H = params['w_mlp'].shape[0]
    rows = S * B
    mxu_dtype = jnp.bfloat16                   # MXU operands; math/carry stay f32
    gx_dtype = jnp.bfloat16                    # gx HBM round-trip in bf16

    vmem_cap = _vmem_capacity_bytes()
    budget = vmem_cap // 3                     # per-kernel tile-selection budget
    vmem_limit = int(vmem_cap * 3 // 4)        # raise above the 32 MiB default

    # --- one-time parameter prep (tiny; outside the kernels) -----------------
    w_mlp_T = params['w_mlp'].T.astype(mxu_dtype)               # (I, H)
    b_mlp = params['b_mlp'].reshape(1, H).astype(jnp.float32)
    wihT = params['w_ih'].T.astype(mxu_dtype)                   # (H, 3H); (r,z,n)
    whhT = params['w_hh'].T.astype(mxu_dtype)                   # (H, 3H)
    b_ih, b_hh = params['b_ih'], params['b_hh']
    # b_hh_r / b_hh_z fold linearly into the x path; b_hh_n stays in-loop (scaled by r)
    bih_fused = jnp.concatenate(
        [b_ih[:2 * H] + b_hh[:2 * H], b_ih[2 * H:]]).reshape(1, 3 * H).astype(jnp.float32)
    bhn = b_hh[2 * H:].reshape(1, H).astype(jnp.float32)

    # --- Kernel 1: relu(x @ Wmlp^T + b) @ W_ih^T + bias, row-tiled ------------
    TM = _pick_row_tile(rows, I, H, budget)
    x2d = x.reshape(rows, I).astype(jnp.float32)
    const2d = lambda i: (0, 0)

    gx = pl.pallas_call(
        partial(mlp_gx_kernel, mxu_dtype=mxu_dtype),
        out_shape=jax.ShapeDtypeStruct((rows, 3 * H), gx_dtype),
        grid_spec=pltpu.PrefetchScalarGridSpec(
            num_scalar_prefetch=0,
            grid=(pl.cdiv(rows, TM),),
            in_specs=[
                pl.BlockSpec((TM, I), lambda i: (i, 0)),        # x rows
                pl.BlockSpec((I, H), const2d),                  # W_mlp^T  (resident)
                pl.BlockSpec((1, H), const2d),                  # b_mlp
                pl.BlockSpec((H, 3 * H), const2d),              # W_ih^T   (resident)
                pl.BlockSpec((1, 3 * H), const2d),              # fused gate biases
            ],
            out_specs=pl.BlockSpec((TM, 3 * H), lambda i: (i, 0)),
        ),
        compiler_params=pltpu.CompilerParams(
            dimension_semantics=("parallel",),
            vmem_limit_bytes=vmem_limit),
    )(x2d, w_mlp_T, b_mlp, wihT, bih_fused)

    gx3 = gx.reshape(S, B, 3 * H)

    # --- Kernel 2: serial recurrence over time --------------------------------
    if h0 is None:
        h0 = jnp.zeros((1, B, H), jnp.float32)   # nn.GRU semantics when hn is None
    else:
        h0 = h0.astype(jnp.float32)

    # Batch split over the 2nd TensorCore (v7x) when the blocks stay (8,·)-legal.
    n_bb = 2 if (B % 16 == 0) else 1
    B_blk = B // n_bb
    T_blk = _pick_time_block(S, B_blk, H, budget)
    fuse_hh = (H % 128 == 0)                     # fused h@W_hh only if slices lane-align
    unroll = min(T_blk, 4)                       # bounded unroll (avoid vreg spills)

    gru_out = pl.pallas_call(
        partial(gru_kernel, t_blk=T_blk, hidden=H, unroll=unroll, fuse_hh=fuse_hh),
        out_shape=jax.ShapeDtypeStruct((S, B, H), jnp.float32),
        grid_spec=pltpu.PrefetchScalarGridSpec(
            num_scalar_prefetch=0,
            grid=(n_bb, S // T_blk),
            in_specs=[
                pl.BlockSpec((T_blk, B_blk, 3 * H), lambda b, t: (t, b, 0)),  # gx
                pl.BlockSpec((1, B_blk, H), lambda b, t: (0, b, 0)),          # h0
                pl.BlockSpec((H, 3 * H), lambda b, t: (0, 0)),                # W_hh^T
                pl.BlockSpec((1, H), lambda b, t: (0, 0)),                    # b_hh_n
            ],
            out_specs=pl.BlockSpec((T_blk, B_blk, H), lambda b, t: (t, b, 0)),
            scratch_shapes=[pltpu.VMEM((B_blk, H), jnp.float32)],             # h carry
        ),
        compiler_params=pltpu.CompilerParams(
            dimension_semantics=("parallel", "arbitrary"),   # batch ∥, time serial
            vmem_limit_bytes=vmem_limit),
    )(gx3, h0, whhT, bhn)

    hn = gru_out[-1:]                                        # (1, B, H)
    # torch returns (gru_out, (hn, hn.clone().detach())); detach -> stop_gradient.
    return gru_out, (hn, jax.lax.stop_gradient(hn))


# --- Pure-JAX reference (for correctness check) -------------------------------
def reference_forward(x, params, h0=None):
    S, B, I = x.shape
    H = params['w_mlp'].shape[0]
    y = jnp.maximum(x @ params['w_mlp'].T + params['b_mlp'], 0.0)
    h = jnp.zeros((B, H), jnp.float32) if h0 is None else h0[0]
    w_ih, w_hh = params['w_ih'], params['w_hh']
    b_ih, b_hh = params['b_ih'], params['b_hh']

    def step(h, x_t):
        gx = x_t @ w_ih.T + b_ih
        gh = h @ w_hh.T + b_hh
        r = jax.nn.sigmoid(gx[:, :H] + gh[:, :H])
        z = jax.nn.sigmoid(gx[:, H:2 * H] + gh[:, H:2 * H])
        n = jnp.tanh(gx[:, 2 * H:] + r * gh[:, 2 * H:])
        h_new = (1.0 - z) * n + z * h
        return h_new, h_new

    h_last, outs = jax.lax.scan(step, h, y)
    return outs, h_last[None]


if __name__ == "__main__":
    S, B, I, H = 8, 2, 16, 32   # seq, batch, input_size, hidden_size

    key = jax.random.PRNGKey(0)
    keys = jax.random.split(key, 8)
    bi = 1.0 / np.sqrt(I)
    bh = 1.0 / np.sqrt(H)

    b_ih = jax.random.uniform(keys[4], (3 * H,), jnp.float32, -bh, bh)
    b_hh = jax.random.uniform(keys[5], (3 * H,), jnp.float32, -bh, bh)
    # module __init__: param.data[:hidden_size] = -1 for every GRU bias
    b_ih = b_ih.at[:H].set(-1.0)
    b_hh = b_hh.at[:H].set(-1.0)

    params = {
        'w_mlp': jax.random.uniform(keys[0], (H, I), jnp.float32, -bi, bi),
        'b_mlp': jax.random.uniform(keys[1], (H,), jnp.float32, -bi, bi),
        'w_ih': jax.random.uniform(keys[2], (3 * H, H), jnp.float32, -bh, bh),
        'w_hh': jax.random.uniform(keys[3], (3 * H, H), jnp.float32, -bh, bh),
        'b_ih': b_ih,
        'b_hh': b_hh,
    }

    x = jax.random.normal(keys[6], (S, B, I), jnp.float32)

    gru_out, (hn, hn_detached) = gru_forward(x, params)
    jax.block_until_ready(gru_out)
    jax.block_until_ready(hn)

    ref_out, ref_hn = reference_forward(x, params)
    assert gru_out.shape == (S, B, H) and hn.shape == (1, B, H)
    # Tolerance reflects the intentional bf16 MXU-operand / bf16 gx path
    # (f32 accumulation, f32 gate math and hidden-state carry).
    assert np.allclose(np.asarray(gru_out), np.asarray(ref_out), atol=2e-2, rtol=2e-2)
    assert np.allclose(np.asarray(hn), np.asarray(ref_hn), atol=2e-2, rtol=2e-2)

    print("KERNEL_OK")
</pallas_src>

<mosaic_0001>
module attributes {stable_mosaic.version = 11 : i64} {
  func.func @mlp_gx_kernel(%arg0: i32, %arg1: memref<16x16xf32, #tpu.memory_space<vmem>>, %arg2: memref<16x32xbf16, #tpu.memory_space<vmem>>, %arg3: memref<1x32xf32, #tpu.memory_space<vmem>>, %arg4: memref<32x96xbf16, #tpu.memory_space<vmem>>, %arg5: memref<1x96xf32, #tpu.memory_space<vmem>>, %arg6: memref<16x96xbf16, #tpu.memory_space<vmem>>) attributes {dimension_semantics = [#tpu.dimension_semantics<parallel>], iteration_bounds = array<i64: 1>, scalar_prefetch = 0 : i64, scratch_operands = 0 : i64, tpu.core_type = #tpu.core_type<tc>, window_params = [{transform_indices = @transform_0, window_bounds = array<i64: 16, 16>}, {pipeline_mode = #tpu.pipeline_mode<synchronous>, transform_indices = @transform_1, window_bounds = array<i64: 16, 32>}, {pipeline_mode = #tpu.pipeline_mode<synchronous>, transform_indices = @transform_2, window_bounds = array<i64: 1, 32>}, {pipeline_mode = #tpu.pipeline_mode<synchronous>, transform_indices = @transform_3, window_bounds = array<i64: 32, 96>}, {pipeline_mode = #tpu.pipeline_mode<synchronous>, transform_indices = @transform_4, window_bounds = array<i64: 1, 96>}, {transform_indices = @transform_5, window_bounds = array<i64: 16, 96>}]} {
    %c0 = arith.constant 0 : index
    %c0_0 = arith.constant 0 : index
    %0 = vector.load %arg1[%c0, %c0_0] : memref<16x16xf32, #tpu.memory_space<vmem>>, vector<16x16xf32>
    %1 = arith.truncf %0 : vector<16x16xf32> to vector<16x16xbf16>
    %c0_1 = arith.constant 0 : index
    %c0_2 = arith.constant 0 : index
    %2 = vector.load %arg2[%c0_1, %c0_2] : memref<16x32xbf16, #tpu.memory_space<vmem>>, vector<16x32xbf16>
    %cst = arith.constant dense<0.000000e+00> : vector<16x32xf32>
    %3 = tpu.matmul %1, %2, %cst {dimension_numbers = #tpu.dot_dimension_numbers<[1], [0], [0], [1], [0, 0, 1, 1], [], []>} : vector<16x16xbf16>, vector<16x32xbf16>, vector<16x32xf32> -> vector<16x32xf32>
    %c0_3 = arith.constant 0 : index
    %c0_4 = arith.constant 0 : index
    %4 = vector.load %arg3[%c0_3, %c0_4] : memref<1x32xf32, #tpu.memory_space<vmem>>, vector<1x32xf32>
    %5 = vector.broadcast %4 : vector<1x32xf32> to vector<16x32xf32>
    %6 = arith.addf %3, %5 : vector<16x32xf32>
    %cst_5 = arith.constant 0.000000e+00 : f32
    %7 = vector.broadcast %cst_5 : f32 to vector<16x32xf32>
    %8 = arith.maximumf %6, %7 : vector<16x32xf32>
    %9 = arith.truncf %8 : vector<16x32xf32> to vector<16x32xbf16>
    %c0_6 = arith.constant 0 : index
    %c0_7 = arith.constant 0 : index
    %10 = vector.load %arg4[%c0_6, %c0_7] : memref<32x96xbf16, #tpu.memory_space<vmem>>, vector<32x96xbf16>
    %cst_8 = arith.constant dense<0.000000e+00> : vector<16x96xf32>
    %11 = tpu.matmul %9, %10, %cst_8 {dimension_numbers = #tpu.dot_dimension_numbers<[1], [0], [0], [1], [0, 0, 1, 1], [], []>} : vector<16x32xbf16>, vector<32x96xbf16>, vector<16x96xf32> -> vector<16x96xf32>
    %c0_9 = arith.constant 0 : index
    %c0_10 = arith.constant 0 : index
    %12 = vector.load %arg5[%c0_9, %c0_10] : memref<1x96xf32, #tpu.memory_space<vmem>>, vector<1x96xf32>
    %13 = vector.broadcast %12 : vector<1x96xf32> to vector<16x96xf32>
    %14 = arith.addf %11, %13 : vector<16x96xf32>
    %15 = arith.truncf %14 : vector<16x96xf32> to vector<16x96xbf16>
    %c0_11 = arith.constant 0 : index
    %c0_12 = arith.constant 0 : index
    %16 = vector.load %arg6[%c0_11, %c0_12] : memref<16x96xbf16, #tpu.memory_space<vmem>>, vector<16x96xbf16>
    tpu.vector_store %arg6[%c0_11, %c0_12], %15 {strides = array<i32>} : memref<16x96xbf16, #tpu.memory_space<vmem>>, vector<16x96xbf16>,
    return
  }
  func.func @transform_0(%arg0: i32) -> (i32, i32) {
    %c0_i32 = arith.constant 0 : i32
    %c0_i32_0 = arith.constant 0 : i32
    return %arg0, %c0_i32 : i32, i32
  }
  func.func @transform_1(%arg0: i32) -> (i32, i32) {
    %c0_i32 = arith.constant 0 : i32
    %c0_i32_0 = arith.constant 0 : i32
    %c0_i32_1 = arith.constant 0 : i32
    return %c0_i32, %c0_i32_0 : i32, i32
  }
  func.func @transform_2(%arg0: i32) -> (i32, i32) {
    %c0_i32 = arith.constant 0 : i32
    %c0_i32_0 = arith.constant 0 : i32
    %c0_i32_1 = arith.constant 0 : i32
    return %c0_i32, %c0_i32_0 : i32, i32
  }
  func.func @transform_3(%arg0: i32) -> (i32, i32) {
    %c0_i32 = arith.constant 0 : i32
    %c0_i32_0 = arith.constant 0 : i32
    %c0_i32_1 = arith.constant 0 : i32
    return %c0_i32, %c0_i32_0 : i32, i32
  }
  func.func @transform_4(%arg0: i32) -> (i32, i32) {
    %c0_i32 = arith.constant 0 : i32
    %c0_i32_0 = arith.constant 0 : i32
    %c0_i32_1 = arith.constant 0 : i32
    return %c0_i32, %c0_i32_0 : i32, i32
  }
  func.func @transform_5(%arg0: i32) -> (i32, i32) {
    %c0_i32 = arith.constant 0 : i32
    %c0_i32_0 = arith.constant 0 : i32
    return %arg0, %c0_i32 : i32, i32
  }
}

</mosaic_0001>

<bundles_post_ra>
// kernel: tpu_custom_call.1
= control target key start
LH: loop header
LB: loop body
LE: loop exit
PB: predicated region body
PF: predicated region fallthrough
CT: control target
= control target key end

     0   :  { %10 = vsyncpa [#allocation3], 0  ;;  %s466_s0 = inlined_call_operand.hbm [shape: f32[16,16], index: 0, kind: input, shape index: {}]   ;;  %s467_s1 = inlined_call_operand.hbm [shape: bf16[16,32], index: 1, kind: input, shape index: {}]   ;;  %s468_s2 = inlined_call_operand.vmem [shape: f32[1,32], index: 2, kind: input, shape index: {}]   ;;  %s469_s3 = inlined_call_operand.hbm [shape: bf16[32,96], index: 3, kind: input, shape index: {}]   ;;  %s470_s4 = inlined_call_operand.vmem [shape: f32[1,96], index: 4, kind: input, shape index: {}]   ;;  %s471_s5 = inlined_call_operand.hbm [shape: bf16[16,96], index: 5, kind: output, shape index: {}]  }
   0x1   :  { %11 = vsyncpa [#allocation6], 0 }
   0x2   :  { %12 = vsyncpa [#allocation4], 0  ;;  %s363_s18 = smov [#allocation5]   ;;  %s269_s22 = scalar_lea.hbm %s467_s1, 128 }
   0x3   :  { %s30_s19 = sshll.u32 %s363_s18, 4  ;;  %p270_p0 = scmp.ne.s32.totalorder %s467_s1, %s269_s22  ;;  %s31_s19 = int_to_ptr.vmem [resolvable:$true] %s30_s19 }
   0x4   :  { %p273_p1 = scmp.lt.u32.totalorder %s269_s22, %s467_s1 }
   0x6   :  { %p275_p2 = pnand %p273_p1, %p270_p0 }
   0x8   :  { %278 = shalt.err (!%p275_p2)
}
   0x9   :  { %s279_s27 = scalar_lea.vmem %s31_s19, 128  ;;  %p284_p4 = scmp.lt.s32.totalorder %s31_s19, %s31_s19 }
   0xa   :  { %p280_p3 = scmp.ne.s32.totalorder %s31_s19, %s279_s27  ;;  %p285_p5 = scmp.lt.s32.totalorder %s279_s27, %s279_s27 }
   0xc   :  { %p286_p6 = por %p285_p5, %p284_p4 }
   0xe   :  { %p287_p7 = pnand %p286_p6, %p280_p3 }
  0x10   :  { %290 = shalt.err (!%p287_p7)
}
  0x11   :  { %s364_s28 = smov 64   ;;  %s365_s29 = smov 4  }
  0x12   :  { %36 = dma.hbm_to_vmem [thread:$0]  %s467_s1, 128, %s31_s19, [#allocation6], %s364_s28, %s364_s28, %s365_s29  }
  0x13   :  { %s366_s7 = smov [#allocation2]   ;;  %s291_s11 = scalar_lea.hbm %s466_s0, 256 }
  0x14   :  { %s18_s8 = sshll.u32 %s366_s7, 4  ;;  %p292_p8 = scmp.ne.s32.totalorder %s466_s0, %s291_s11  ;;  %s19_s8 = int_to_ptr.vmem [resolvable:$true] %s18_s8 }
  0x15   :  { %p295_p9 = scmp.lt.u32.totalorder %s291_s11, %s466_s0 }
  0x17   :  { %p297_p10 = pnand %p295_p9, %p292_p8 }
  0x19   :  { %300 = shalt.err (!%p297_p10)
}
  0x1a   :  { %s301_s16 = scalar_lea.vmem %s19_s8, 256  ;;  %p306_p12 = scmp.lt.s32.totalorder %s19_s8, %s19_s8 }
  0x1b   :  { %p302_p11 = scmp.ne.s32.totalorder %s19_s8, %s301_s16  ;;  %p307_p13 = scmp.lt.s32.totalorder %s301_s16, %s301_s16 }
  0x1d   :  { %p308_p0 = por %p307_p13, %p306_p12 }
  0x1f   :  { %p309_p1 = pnand %p308_p0, %p302_p11 }
  0x21   :  { %312 = shalt.err (!%p309_p1)
}
  0x22   :  { %s367_s1 = smov 128   ;;  %s368_s17 = smov 8  }
  0x23   :  { %24 = dma.hbm_to_vmem [thread:$0]  %s466_s0, 256, %s19_s8, [#allocation3], %s367_s1, %s367_s1, %s368_s17  }
  0x24   :  { %s369_s20 = smov [#allocation7]   ;;  %s313_s24 = scalar_lea.hbm %s469_s3, 256 }
  0x25   :  { %s44_s21 = sshll.u32 %s369_s20, 4  ;;  %p314_p2 = scmp.ne.s32.totalorder %s469_s3, %s313_s24  ;;  %s45_s21 = int_to_ptr.vmem [resolvable:$true] %s44_s21 }
  0x26   :  { %p317_p3 = scmp.lt.u32.totalorder %s313_s24, %s469_s3 }
  0x28   :  { %p319_p4 = pnand %p317_p3, %p314_p2 }
  0x2a   :  { %322 = shalt.err (!%p319_p4)
}
  0x2b   :  { %s323_s6 = scalar_lea.vmem %s45_s21, 256  ;;  %p328_p6 = scmp.lt.s32.totalorder %s45_s21, %s45_s21 }
  0x2c   :  { %p324_p5 = scmp.ne.s32.totalorder %s45_s21, %s323_s6  ;;  %p329_p7 = scmp.lt.s32.totalorder %s323_s6, %s323_s6 }
  0x2e   :  { %p330_p8 = por %p329_p7, %p328_p6 }
  0x30   :  { %p331_p9 = pnand %p330_p8, %p324_p5 }
  0x32   :  { %334 = shalt.err (!%p331_p9)
}
  0x33   :  { %50 = dma.hbm_to_vmem [thread:$0]  %s469_s3, 256, %s45_s21, [#allocation6], %s364_s28, %s364_s28, %s365_s29  }
  0x34   :  { %357 = dma.done.wait [#allocation3], 256  }
  0x35   :  { %358 = vsyncadd [#allocation3], 4294967040 }
  0x36   :  { %359 = dma.done.wait [#allocation6], 384  }
  0x37   :  { %360 = vsyncadd [#allocation6], 4294966912  ;;  %v370_v0 = vmov 0.0   ;;  %vm371_vm0 = vmmov 0   ;;  %v266_v1 = vld [vmem:[#allocation5] sm:$0xff]   ;;  %v63_v2 = vld [vmem:[#allocation2] sm:$0xff] }
  0x38   :  { %242 = vmatprep.subr.bf16.mxu0 %v370_v0  ;;  %244 = vmatprep.mubr.msk.bf16.mxu0 %vm371_vm0, %v370_v0  ;;  %v64_v3 = vld [vmem:[#allocation2 + $0x8] sm:$0xff]  ;;  %vm81_vm1 = vcmask 130048   ;;  %v267_v5 = vld [vmem:[#allocation7] sm:$0xff]   ;;  %v268_v6 = vld [vmem:[#allocation7 + $0x8] sm:$0xff]   ;;  %vm152_vm2 = vcmask 261120   ;;  %vm205_vm3 = vcmask 781312  }
  0x39   :  { %248 = vmatprep.subr.bf16.mxu1 %v370_v0  ;;  %252 = vmatprep.mubr.msk.bf16.mxu1 %vm371_vm0, %v370_v0  ;;  %v65_v4 = vpack.c.bf16 %v64_v3, %v63_v2  ;;  %v226_v7 = vld [vmem:[%s468_s2] ss:$0 sm:$0xff]  ;;  %s372_s2 = smov [#allocation8]  }
  0x3a   :  { %243 = vmatpush3.bf16.msra.mxu0 %v266_v1  ;;  %249 = vmatpush3.bf16.msra.mxu1 %v267_v5  ;;  %v229_v17 = vld [vmem:[%s470_s4] ss:$0 sm:$0xff]  ;;  %s213_s11 = sshll.u32 %s372_s2, 4  ;;  %s214_s11 = int_to_ptr.vmem [resolvable:$true] %s213_s11 }
  0x3b   :  { %250 = vmatprep.subr.bf16.mxu1 %v370_v0  ;;  %s335_s12 = scalar_lea.vmem %s214_s11, 128  ;;  %p340_p11 = scmp.lt.s32.totalorder %s214_s11, %s214_s11 }
  0x3c   :  { %p336_p10 = scmp.ne.s32.totalorder %s214_s11, %s335_s12  ;;  %p341_p12 = scmp.lt.s32.totalorder %s335_s12, %s335_s12 }
  0x3d   :  { %245 = vmatmul.mubr.msk.bf16.vlgmr.msra.gmra.mrb[0].mxu0 %vm81_vm1, %v65_v4 }
  0x3e   :  { %251 = vmatpush3.bf16.msra.mxu1 %v268_v6  ;;  %p342_p13 = por %p341_p12, %p340_p11 }
  0x40   :  { %p343_p0 = pnand %p342_p13, %p336_p10 }
 0x110   :  { %v119_v8 = vpop.f32.mrb[0].mxu0 }
 0x111   :  { %v120_v9 = vadd.f32 %v226_v7, %v119_v8  ;;  %v246_v10 = vpop.f32.mrb[1].mxu0 }
 0x112   :  { %v122_v11 = vpop.f32.mrb[2].mxu0 }
 0x113   :  { %v123_v12 = vadd.f32 %v226_v7, %v122_v11  ;;  %v247_v13 = vpop.f32.mrb[3].mxu0  ;;  %v126_v14 = vmax.f32 %v120_v9, 0.0 }
 0x115   :  { %v127_v15 = vmax.f32 %v123_v12, 0.0 }
 0x117   :  { %v128_v16 = vpack.c.bf16 %v127_v15, %v126_v14 }
 0x119   :  { %253 = vmatmul.mubr.msk.bf16.vlgmr.msra.gmra.mrb[0].mxu1 %vm152_vm2, %v128_v16 }
 0x1ec   :  { %v190_v18 = vpop.f32.mrb[0].mxu1 }
 0x1ed   :  { %v191_v19 = vadd.f32 %v229_v17, %v190_v18  ;;  %v254_v20 = vpop.f32.mrb[1].mxu1 }
 0x1ee   :  { %v193_v21 = vpop.f32.mrb[2].mxu1 }
 0x1ef   :  { %v235_v22 = vpack.c.bf16 %v191_v19, %v191_v19  ;;  %v194_v23 = vadd.f32 %v229_v17, %v193_v21  ;;  %v255_v24 = vpop.f32.mrb[3].mxu1 }
 0x1f1   :  { %v236_v25 = vpack.c.bf16 %v194_v23, %v194_v23  ;;  %206 = vst.msk [vmem:[#allocation8] sm:$0xf] %vm205_vm3, %v235_v22 }
 0x1f3   :  { %207 = vst.msk [vmem:[#allocation8 + $0x4] sm:$0xf] %vm205_vm3, %v236_v25 }
 0x1f4   :  { %346 = shalt.err (!%p343_p0)
}
 0x1f5   :  { %s347_s14 = scalar_lea.hbm %s471_s5, 128 }
 0x1f6   :  { %p348_p1 = scmp.ne.s32.totalorder %s471_s5, %s347_s14  ;;  %p351_p2 = scmp.lt.u32.totalorder %s347_s14, %s471_s5 }
 0x1f8   :  { %p353_p3 = pnand %p351_p2, %p348_p1 }
 0x1fa   :  { %356 = shalt.err (!%p353_p3)
}
 0x1fb   :  { %219 = dma.vmem_to_hbm [thread:$0]  %s214_s11, 128, %s471_s5, [#allocation4], %s364_s28, %s364_s28, %s365_s29  }
 0x1fc   :  { %361 = dma.done.wait [#allocation4], 128  }
 0x1fd   :  { %362 = vsyncadd [#allocation4], 4294967168 }
 0x1fe   :  { %223 = vsyncpa [#allocation3], 1 }
 0x1ff   :  { %224 = vsyncpa [#allocation6], 1 }
 0x200   :  { %225 = vsyncpa [#allocation4], 1 }

</bundles_post_ra>
